<compile_context>
chip_gen: v7x
topology: tpu7x:2x2x1
jax: 0.10.0
libtpu: 0.0.40
codegen_flags: <defaults>
</compile_context>

<pallas_src>
import jax
import jax.numpy as jnp
from jax import lax
from jax.experimental import pallas as pl
from jax.experimental.pallas import tpu as pltpu

_LANE = 128
_NEG_BIG = -1e30                      # padded-class logit value (exp underflows to 0)
_VMEM_LIMIT = 48 * 1024 * 1024        # explicit scoped-VMEM cap (fits v5e/v6e/v7x)


def _round_up(x, m):
    return ((x + m - 1) // m) * m


def _pad2d(a, rows, cols):
    return jnp.pad(a, ((0, rows - a.shape[0]), (0, cols - a.shape[1])))


# --------------------------- kernel bodies ---------------------------
def _transform_kernel(x_ref, w_ref, xw_ref):
    """XW tile = X tile @ W  (bf16 MXU operands, f32 accumulate, bf16 out)."""
    xw_ref[...] = jnp.dot(
        x_ref[...].astype(jnp.bfloat16), w_ref[...],
        preferred_element_type=jnp.float32).astype(jnp.bfloat16)


def _agg_kernel(a_ref, xw_ref, b_ref, out_ref, acc_ref):
    """out row-tile = relu(A_hat row-panel @ XW + b), K-tiled with f32 accumulator."""
    k = pl.program_id(1)

    @pl.when(k == 0)
    def _():
        acc_ref[...] = jnp.zeros_like(acc_ref)

    acc_ref[...] += jnp.dot(a_ref[...], xw_ref[...],
                            preferred_element_type=jnp.float32)

    @pl.when(k == pl.num_programs(1) - 1)
    def _():
        pre = acc_ref[...] + b_ref[...]
        out_ref[...] = jnp.maximum(pre, 0.0)
        # TODO(synk): dropout omitted (eval mode / training=False -> identity)


def _agg_head_kernel(a_ref, xw_ref, b_ref, w12_ref, b12_ref,
                     emb_ref, logp_ref, acc_ref):
    """Last GCN layer + collapsed MLP head + log_softmax, fused in the epilogue."""
    k = pl.program_id(1)

    @pl.when(k == 0)
    def _():
        acc_ref[...] = jnp.zeros_like(acc_ref)

    acc_ref[...] += jnp.dot(a_ref[...], xw_ref[...],
                            preferred_element_type=jnp.float32)

    @pl.when(k == pl.num_programs(1) - 1)
    def _():
        pre = acc_ref[...] + b_ref[...]
        emb_ref[...] = pre                       # pre-activation the caller sees
        x = jnp.maximum(pre, 0.0)
        # Collapsed head: (x@W1+b1)@W2+b2 == x@W12 + b12.  Tiny matmul -> keep f32.
        # Padded class lanes carry -1e30 via b12, so no in-kernel mask is needed.
        logits = jnp.dot(x, w12_ref[...],
                         preferred_element_type=jnp.float32) + b12_ref[...]
        m = jnp.max(logits, axis=1, keepdims=True)
        z = logits - m
        lse = jnp.log(jnp.sum(jnp.exp(z), axis=1, keepdims=True))
        logp_ref[...] = z - lse


# --------------------------- pallas_call wrappers ---------------------------
def _transform(x_f32, w_bf16, *, tm):
    n_p, d_p = x_f32.shape
    h_p = w_bf16.shape[1]
    return pl.pallas_call(
        _transform_kernel,
        out_shape=jax.ShapeDtypeStruct((n_p, h_p), jnp.bfloat16),
        grid_spec=pltpu.PrefetchScalarGridSpec(
            num_scalar_prefetch=0,
            grid=(n_p // tm,),
            in_specs=[pl.BlockSpec((tm, d_p), lambda i: (i, 0)),
                      pl.BlockSpec((d_p, h_p), lambda i: (0, 0))],
            out_specs=pl.BlockSpec((tm, h_p), lambda i: (i, 0)),
        ),
        compiler_params=pltpu.CompilerParams(
            dimension_semantics=("parallel",),
            vmem_limit_bytes=_VMEM_LIMIT),
        cost_estimate=pl.CostEstimate(
            flops=2 * n_p * d_p * h_p,
            transcendentals=0,
            bytes_accessed=n_p * d_p * 4 + d_p * h_p * 2 + n_p * h_p * 2),
    )(x_f32, w_bf16)


def _aggregate(a_bf16, xw_bf16, bias_f32, *, tm, tk):
    n_p = a_bf16.shape[0]
    h_p = xw_bf16.shape[1]
    return pl.pallas_call(
        _agg_kernel,
        out_shape=jax.ShapeDtypeStruct((n_p, h_p), jnp.float32),
        grid_spec=pltpu.PrefetchScalarGridSpec(
            num_scalar_prefetch=0,
            grid=(n_p // tm, n_p // tk),
            in_specs=[pl.BlockSpec((tm, tk), lambda i, k: (i, k)),
                      pl.BlockSpec((tk, h_p), lambda i, k: (k, 0)),
                      pl.BlockSpec((1, h_p), lambda i, k: (0, 0))],
            out_specs=pl.BlockSpec((tm, h_p), lambda i, k: (i, 0)),
            scratch_shapes=[pltpu.VMEM((tm, h_p), jnp.float32)],
        ),
        compiler_params=pltpu.CompilerParams(
            dimension_semantics=("parallel", "arbitrary"),
            vmem_limit_bytes=_VMEM_LIMIT),
        cost_estimate=pl.CostEstimate(
            flops=2 * n_p * n_p * h_p,
            transcendentals=0,
            bytes_accessed=(n_p * n_p * 2 + n_p * h_p * 2 + h_p * 4
                            + n_p * h_p * 4)),
    )(a_bf16, xw_bf16, bias_f32)


def _aggregate_head(a_bf16, xw_bf16, bias_f32, w12_f32, b12_f32, *, tm, tk):
    n_p = a_bf16.shape[0]
    h_p = xw_bf16.shape[1]
    o_p = w12_f32.shape[1]
    return pl.pallas_call(
        _agg_head_kernel,
        out_shape=(jax.ShapeDtypeStruct((n_p, h_p), jnp.float32),
                   jax.ShapeDtypeStruct((n_p, o_p), jnp.float32)),
        grid_spec=pltpu.PrefetchScalarGridSpec(
            num_scalar_prefetch=0,
            grid=(n_p // tm, n_p // tk),
            in_specs=[pl.BlockSpec((tm, tk), lambda i, k: (i, k)),
                      pl.BlockSpec((tk, h_p), lambda i, k: (k, 0)),
                      pl.BlockSpec((1, h_p), lambda i, k: (0, 0)),
                      pl.BlockSpec((h_p, o_p), lambda i, k: (0, 0)),
                      pl.BlockSpec((1, o_p), lambda i, k: (0, 0))],
            out_specs=(pl.BlockSpec((tm, h_p), lambda i, k: (i, 0)),
                       pl.BlockSpec((tm, o_p), lambda i, k: (i, 0))),
            scratch_shapes=[pltpu.VMEM((tm, h_p), jnp.float32)],
        ),
        compiler_params=pltpu.CompilerParams(
            dimension_semantics=("parallel", "arbitrary"),
            vmem_limit_bytes=_VMEM_LIMIT),
        cost_estimate=pl.CostEstimate(
            flops=2 * n_p * n_p * h_p + 2 * n_p * h_p * o_p,
            transcendentals=n_p * o_p + n_p,
            bytes_accessed=(n_p * n_p * 2 + n_p * h_p * 2 + h_p * 4
                            + h_p * o_p * 4 + o_p * 4
                            + n_p * h_p * 4 + n_p * o_p * 4)),
    )(a_bf16, xw_bf16, bias_f32, w12_f32, b12_f32)


# ------------------------------ forward pass ------------------------------
def gcn_forward(params, x, a_hat):
    convs = params["convs"]
    w1, b1, w2, b2 = params["post_mp"]
    num_convs = len(convs)

    n, f_in = x.shape
    hidden = convs[-1][0].shape[1]
    out_dim = w2.shape[1]

    h_p = _round_up(hidden, _LANE)
    o_p = _round_up(out_dim, _LANE)
    f_p = _round_up(f_in, _LANE)

    # Pad N to a multiple of 128 lanes; pick row/K tiles that divide it exactly.
    n_p = _round_up(n, _LANE)
    if n_p >= 512:
        n_p = _round_up(n_p, 512)
        tm, tk = 256, 512           # A row-panel (tm,tk) bf16 = 256 KiB, x2 buffers
    else:
        tm, tk = 128, n_p           # small graphs: single K block

    # bf16 MXU operand for the aggregation (halves A bytes); f32 accumulation.
    a_pad = _pad2d(a_hat.astype(jnp.float32), n_p, n_p).astype(jnp.bfloat16)

    # Collapse the eval-mode MLP head (Dropout = identity, no nonlinearity between).
    w12 = jnp.dot(w1, w2)
    b12 = jnp.dot(b1, w2) + b2
    w12_p = _pad2d(w12, h_p, o_p)
    # Bake the padded-class mask into the bias: padded lanes become -1e30 logits.
    b12_p = jnp.full((1, o_p), _NEG_BIG, jnp.float32).at[:, :out_dim].set(b12)

    cur = _pad2d(x.astype(jnp.float32), n_p, f_p)   # activations stay f32 in HBM
    emb_p = None
    logp_p = None
    for li, (w, b) in enumerate(convs):
        d_p = cur.shape[1]
        w_p = _pad2d(w, d_p, h_p).astype(jnp.bfloat16)
        b_p = _pad2d(b, 1, h_p)
        xw = _transform(cur, w_p, tm=tm)                       # (n_p, h_p) bf16
        if li < num_convs - 1:
            cur = _aggregate(a_pad, xw, b_p, tm=tm, tk=tk)     # relu(A@XW + b), f32
        else:
            emb_p, logp_p = _aggregate_head(a_pad, xw, b_p, w12_p, b12_p,
                                            tm=tm, tk=tk)

    return emb_p[:n, :hidden], logp_p[:n, :out_dim]


gcn_forward_jit = jax.jit(gcn_forward)


# ------------------------------ glue (JAX) ------------------------------
def normalized_adjacency(edge_index, num_nodes):
    """Dense A_hat = D^-1/2 (A + I) D^-1/2, self-loops added without duplication."""
    src, dst = edge_index[0], edge_index[1]
    a = jnp.zeros((num_nodes, num_nodes), jnp.float32)
    a = a.at[dst, src].set(1.0)
    a = jnp.maximum(a, jnp.eye(num_nodes, dtype=jnp.float32))
    deg = jnp.sum(a, axis=1)
    d_inv_sqrt = jnp.where(deg > 0, 1.0 / jnp.sqrt(deg), 0.0)
    return a * d_inv_sqrt[:, None] * d_inv_sqrt[None, :]


def init_params(key, input_dim, hidden_dim, out_dim, conv_layers):
    params = {"convs": [], "post_mp": None}
    dims = [input_dim] + [hidden_dim] * (conv_layers + 1)
    for i in range(conv_layers + 1):
        key, kw = jax.random.split(key)
        f_in, f_out = dims[i], dims[i + 1]
        w = jax.random.normal(kw, (f_in, f_out), jnp.float32) * (1.0 / jnp.sqrt(f_in))
        b = jnp.zeros((1, f_out), jnp.float32)
        params["convs"].append((w, b))
    key, k1, k2 = jax.random.split(key, 3)
    w1 = jax.random.normal(k1, (hidden_dim, hidden_dim), jnp.float32) * (1.0 / jnp.sqrt(hidden_dim))
    b1 = jnp.zeros((1, hidden_dim), jnp.float32)
    w2 = jax.random.normal(k2, (hidden_dim, out_dim), jnp.float32) * (1.0 / jnp.sqrt(hidden_dim))
    b2 = jnp.zeros((1, out_dim), jnp.float32)
    params["post_mp"] = (w1, b1, w2, b2)
    return params


def reference_forward(params, x, a_hat, *, bf16_operands=False):
    """Pure-JAX reference of the torch module (eval mode).

    With bf16_operands=True it mirrors the kernel's mixed-precision policy
    (bf16 MXU operands, f32 accumulation) for a tight check.
    """
    a = a_hat.astype(jnp.bfloat16) if bf16_operands else a_hat
    h = x
    pre = x
    for (w, b) in params["convs"]:
        if bf16_operands:
            xw = jnp.dot(h.astype(jnp.bfloat16), w.astype(jnp.bfloat16),
                         preferred_element_type=jnp.float32).astype(jnp.bfloat16)
            pre = jnp.dot(a, xw, preferred_element_type=jnp.float32) + b
        else:
            pre = a @ (h @ w) + b
        h = jnp.maximum(pre, 0.0)
    w1, b1, w2, b2 = params["post_mp"]
    logits = h @ (w1 @ w2) + (b1 @ w2 + b2)
    return pre, jax.nn.log_softmax(logits, axis=1)


if __name__ == "__main__":
    key = jax.random.PRNGKey(0)

    # small synthetic graph: N=16 nodes, undirected ring, 8 input feats
    num_nodes = 16
    input_dim = 8
    hidden_dim = 32
    out_dim = 4
    conv_layers = 2  # module builds conv_layers + 1 = 3 GCNConv layers

    key, kx = jax.random.split(key)
    x = jax.random.normal(kx, (num_nodes, input_dim), jnp.float32)

    src = jnp.arange(num_nodes, dtype=jnp.int32)
    dst = (src + 1) % num_nodes
    edge_index = jnp.stack(
        [jnp.concatenate([src, dst]), jnp.concatenate([dst, src])], axis=0
    )  # (2, 32)

    a_hat = normalized_adjacency(edge_index, num_nodes)
    params = init_params(key, input_dim, hidden_dim, out_dim, conv_layers)

    emb, log_probs = gcn_forward_jit(params, x, a_hat)
    jax.block_until_ready((emb, log_probs))

    assert emb.shape == (num_nodes, hidden_dim)
    assert log_probs.shape == (num_nodes, out_dim)
    # log_softmax rows should sum to ~1 in prob space
    assert jnp.allclose(jnp.sum(jnp.exp(log_probs), axis=1), 1.0, atol=1e-4)

    # Tight check against a reference with the same bf16-operand policy.
    emb_bf, logp_bf = reference_forward(params, x, a_hat, bf16_operands=True)
    assert jnp.allclose(emb, emb_bf, rtol=2e-3, atol=2e-3)
    assert jnp.allclose(log_probs, logp_bf, rtol=2e-3, atol=2e-3)

    # Looser check against the exact f32 semantics of the torch module.
    emb_ref, logp_ref = reference_forward(params, x, a_hat, bf16_operands=False)
    assert jnp.allclose(emb, emb_ref, rtol=1e-1, atol=1e-1)
    assert jnp.allclose(log_probs, logp_ref, rtol=1e-1, atol=1e-1)

    print("KERNEL_OK")
</pallas_src>

<mosaic_0001>
module attributes {stable_mosaic.version = 11 : i64} {
  func.func @_transform_kernel(%arg0: i32, %arg1: memref<128x128xf32, #tpu.memory_space<vmem>>, %arg2: memref<128x128xbf16, #tpu.memory_space<vmem>>, %arg3: memref<128x128xbf16, #tpu.memory_space<vmem>>) attributes {dimension_semantics = [#tpu.dimension_semantics<parallel>], iteration_bounds = array<i64: 1>, scalar_prefetch = 0 : i64, scratch_operands = 0 : i64, tpu.core_type = #tpu.core_type<tc>, window_params = [{transform_indices = @transform_0, window_bounds = array<i64: 128, 128>}, {pipeline_mode = #tpu.pipeline_mode<synchronous>, transform_indices = @transform_1, window_bounds = array<i64: 128, 128>}, {transform_indices = @transform_2, window_bounds = array<i64: 128, 128>}]} {
    %c0 = arith.constant 0 : index
    %c0_0 = arith.constant 0 : index
    %0 = vector.load %arg1[%c0, %c0_0] : memref<128x128xf32, #tpu.memory_space<vmem>>, vector<128x128xf32>
    %1 = arith.truncf %0 : vector<128x128xf32> to vector<128x128xbf16>
    %c0_1 = arith.constant 0 : index
    %c0_2 = arith.constant 0 : index
    %2 = vector.load %arg2[%c0_1, %c0_2] : memref<128x128xbf16, #tpu.memory_space<vmem>>, vector<128x128xbf16>
    %cst = arith.constant dense<0.000000e+00> : vector<128x128xf32>
    %3 = tpu.matmul %1, %2, %cst {dimension_numbers = #tpu.dot_dimension_numbers<[1], [0], [0], [1], [0, 0, 1, 1], [], []>} : vector<128x128xbf16>, vector<128x128xbf16>, vector<128x128xf32> -> vector<128x128xf32>
    %4 = arith.truncf %3 : vector<128x128xf32> to vector<128x128xbf16>
    %c0_3 = arith.constant 0 : index
    %c0_4 = arith.constant 0 : index
    %5 = vector.load %arg3[%c0_3, %c0_4] : memref<128x128xbf16, #tpu.memory_space<vmem>>, vector<128x128xbf16>
    tpu.vector_store %arg3[%c0_3, %c0_4], %4 {strides = array<i32>} : memref<128x128xbf16, #tpu.memory_space<vmem>>, vector<128x128xbf16>,
    return
  }
  func.func @transform_0(%arg0: i32) -> (i32, i32) {
    %c0_i32 = arith.constant 0 : i32
    %c0_i32_0 = arith.constant 0 : i32
    return %arg0, %c0_i32 : i32, i32
  }
  func.func @transform_1(%arg0: i32) -> (i32, i32) {
    %c0_i32 = arith.constant 0 : i32
    %c0_i32_0 = arith.constant 0 : i32
    %c0_i32_1 = arith.constant 0 : i32
    return %c0_i32, %c0_i32_0 : i32, i32
  }
  func.func @transform_2(%arg0: i32) -> (i32, i32) {
    %c0_i32 = arith.constant 0 : i32
    %c0_i32_0 = arith.constant 0 : i32
    return %arg0, %c0_i32 : i32, i32
  }
}

module attributes {stable_mosaic.version = 11 : i64} {
  func.func @_agg_head_kernel(%arg0: i32, %arg1: i32, %arg2: memref<128x128xbf16, #tpu.memory_space<vmem>>, %arg3: memref<128x128xbf16, #tpu.memory_space<vmem>>, %arg4: memref<1x128xf32, #tpu.memory_space<vmem>>, %arg5: memref<128x128xf32, #tpu.memory_space<vmem>>, %arg6: memref<1x128xf32, #tpu.memory_space<vmem>>, %arg7: memref<128x128xf32, #tpu.memory_space<vmem>>, %arg8: memref<128x128xf32, #tpu.memory_space<vmem>>, %arg9: memref<128x128xf32, #tpu.memory_space<vmem>>) attributes {dimension_semantics = [#tpu.dimension_semantics<parallel>, #tpu.dimension_semantics<arbitrary>], iteration_bounds = array<i64: 1, 1>, scalar_prefetch = 0 : i64, scratch_operands = 1 : i64, tpu.core_type = #tpu.core_type<tc>, window_params = [{transform_indices = @transform_0, window_bounds = array<i64: 128, 128>}, {transform_indices = @transform_1, window_bounds = array<i64: 128, 128>}, {pipeline_mode = #tpu.pipeline_mode<synchronous>, transform_indices = @transform_2, window_bounds = array<i64: 1, 128>}, {pipeline_mode = #tpu.pipeline_mode<synchronous>, transform_indices = @transform_3, window_bounds = array<i64: 128, 128>}, {pipeline_mode = #tpu.pipeline_mode<synchronous>, transform_indices = @transform_4, window_bounds = array<i64: 1, 128>}, {transform_indices = @transform_5, window_bounds = array<i64: 128, 128>}, {transform_indices = @transform_6, window_bounds = array<i64: 128, 128>}]} {
    %c0_i32 = arith.constant 0 : i32
    %0 = arith.cmpi eq, %arg1, %c0_i32 : i32
    %1 = arith.extui %0 : i1 to i32
    %c0_i32_0 = arith.constant 0 : i32
    %2 = arith.cmpi ne, %1, %c0_i32_0 : i32
    scf.if %2 {
      %cst_10 = arith.constant 0.000000e+00 : f32
      %12 = vector.broadcast %cst_10 : f32 to vector<128x128xf32>
      %c0_11 = arith.constant 0 : index
      %c0_12 = arith.constant 0 : index
      %13 = vector.load %arg9[%c0_11, %c0_12] : memref<128x128xf32, #tpu.memory_space<vmem>>, vector<128x128xf32>
      tpu.vector_store %arg9[%c0_11, %c0_12], %12 {strides = array<i32>} : memref<128x128xf32, #tpu.memory_space<vmem>>, vector<128x128xf32>,
    } else {
    }
    %c0 = arith.constant 0 : index
    %c0_1 = arith.constant 0 : index
    %3 = vector.load %arg9[%c0, %c0_1] : memref<128x128xf32, #tpu.memory_space<vmem>>, vector<128x128xf32>
    %c0_2 = arith.constant 0 : index
    %c0_3 = arith.constant 0 : index
    %4 = vector.load %arg2[%c0_2, %c0_3] : memref<128x128xbf16, #tpu.memory_space<vmem>>, vector<128x128xbf16>
    %c0_4 = arith.constant 0 : index
    %c0_5 = arith.constant 0 : index
    %5 = vector.load %arg3[%c0_4, %c0_5] : memref<128x128xbf16, #tpu.memory_space<vmem>>, vector<128x128xbf16>
    %cst = arith.constant dense<0.000000e+00> : vector<128x128xf32>
    %6 = tpu.matmul %4, %5, %cst {dimension_numbers = #tpu.dot_dimension_numbers<[1], [0], [0], [1], [0, 0, 1, 1], [], []>} : vector<128x128xbf16>, vector<128x128xbf16>, vector<128x128xf32> -> vector<128x128xf32>
    %7 = arith.addf %3, %6 : vector<128x128xf32>
    %c0_6 = arith.constant 0 : index
    %c0_7 = arith.constant 0 : index
    %8 = vector.load %arg9[%c0_6, %c0_7] : memref<128x128xf32, #tpu.memory_space<vmem>>, vector<128x128xf32>
    tpu.vector_store %arg9[%c0_6, %c0_7], %7 {strides = array<i32>} : memref<128x128xf32, #tpu.memory_space<vmem>>, vector<128x128xf32>,
    %c0_i32_8 = arith.constant 0 : i32
    %9 = arith.cmpi eq, %arg1, %c0_i32_8 : i32
    %10 = arith.extui %9 : i1 to i32
    %c0_i32_9 = arith.constant 0 : i32
    %11 = arith.cmpi ne, %10, %c0_i32_9 : i32
    scf.if %11 {
      %c0_10 = arith.constant 0 : index
      %c0_11 = arith.constant 0 : index
      %12 = vector.load %arg9[%c0_10, %c0_11] : memref<128x128xf32, #tpu.memory_space<vmem>>, vector<128x128xf32>
      %c0_12 = arith.constant 0 : index
      %c0_13 = arith.constant 0 : index
      %13 = vector.load %arg4[%c0_12, %c0_13] : memref<1x128xf32, #tpu.memory_space<vmem>>, vector<1x128xf32>
      %14 = vector.broadcast %13 : vector<1x128xf32> to vector<128x128xf32>
      %15 = arith.addf %12, %14 : vector<128x128xf32>
      %c0_14 = arith.constant 0 : index
      %c0_15 = arith.constant 0 : index
      %16 = vector.load %arg7[%c0_14, %c0_15] : memref<128x128xf32, #tpu.memory_space<vmem>>, vector<128x128xf32>
      tpu.vector_store %arg7[%c0_14, %c0_15], %15 {strides = array<i32>} : memref<128x128xf32, #tpu.memory_space<vmem>>, vector<128x128xf32>,
      %cst_16 = arith.constant 0.000000e+00 : f32
      %17 = vector.broadcast %cst_16 : f32 to vector<128x128xf32>
      %18 = arith.maximumf %15, %17 : vector<128x128xf32>
      %c0_17 = arith.constant 0 : index
      %c0_18 = arith.constant 0 : index
      %19 = vector.load %arg5[%c0_17, %c0_18] : memref<128x128xf32, #tpu.memory_space<vmem>>, vector<128x128xf32>
      %cst_19 = arith.constant dense<0.000000e+00> : vector<128x128xf32>
      %20 = tpu.matmul %18, %19, %cst_19 {dimension_numbers = #tpu.dot_dimension_numbers<[1], [0], [0], [1], [0, 0, 1, 1], [], []>} : vector<128x128xf32>, vector<128x128xf32>, vector<128x128xf32> -> vector<128x128xf32>
      %c0_20 = arith.constant 0 : index
      %c0_21 = arith.constant 0 : index
      %21 = vector.load %arg6[%c0_20, %c0_21] : memref<1x128xf32, #tpu.memory_space<vmem>>, vector<1x128xf32>
      %22 = vector.broadcast %21 : vector<1x128xf32> to vector<128x128xf32>
      %23 = arith.addf %20, %22 : vector<128x128xf32>
      %cst_22 = arith.constant dense<0xFF800000> : vector<128xf32>
      %24 = vector.multi_reduction <maximumf>, %23, %cst_22 [1] : vector<128x128xf32> to vector<128xf32>
      %25 = vector.shape_cast %24 : vector<128xf32> to vector<128x1xf32>
      %26 = vector.broadcast %25 : vector<128x1xf32> to vector<128x128xf32>
      %27 = arith.subf %23, %26 : vector<128x128xf32>
      %28 = math.exp %27 : vector<128x128xf32>
      %cst_23 = arith.constant dense<0.000000e+00> : vector<128xf32>
      %29 = vector.multi_reduction <add>, %28, %cst_23 [1] : vector<128x128xf32> to vector<128xf32>
      %30 = vector.shape_cast %29 : vector<128xf32> to vector<128x1xf32>
      %31 = math.log %30 : vector<128x1xf32>
      %32 = vector.broadcast %31 : vector<128x1xf32> to vector<128x128xf32>
      %33 = arith.subf %27, %32 : vector<128x128xf32>
      %c0_24 = arith.constant 0 : index
      %c0_25 = arith.constant 0 : index
      %34 = vector.load %arg8[%c0_24, %c0_25] : memref<128x128xf32, #tpu.memory_space<vmem>>, vector<128x128xf32>
      tpu.vector_store %arg8[%c0_24, %c0_25], %33 {strides = array<i32>} : memref<128x128xf32, #tpu.memory_space<vmem>>, vector<128x128xf32>,
    } else {
    }
    return
  }
  func.func @transform_0(%arg0: i32, %arg1: i32) -> (i32, i32) {
    %c0_i32 = arith.constant 0 : i32
    return %arg0, %arg1 : i32, i32
  }
  func.func @transform_1(%arg0: i32, %arg1: i32) -> (i32, i32) {
    %c0_i32 = arith.constant 0 : i32
    %c0_i32_0 = arith.constant 0 : i32
    return %arg1, %c0_i32 : i32, i32
  }
  func.func @transform_2(%arg0: i32, %arg1: i32) -> (i32, i32) {
    %c0_i32 = arith.constant 0 : i32
    %c0_i32_0 = arith.constant 0 : i32
    %c0_i32_1 = arith.constant 0 : i32
    return %c0_i32, %c0_i32_0 : i32, i32
  }
  func.func @transform_3(%arg0: i32, %arg1: i32) -> (i32, i32) {
    %c0_i32 = arith.constant 0 : i32
    %c0_i32_0 = arith.constant 0 : i32
    %c0_i32_1 = arith.constant 0 : i32
    return %c0_i32, %c0_i32_0 : i32, i32
  }
  func.func @transform_4(%arg0: i32, %arg1: i32) -> (i32, i32) {
    %c0_i32 = arith.constant 0 : i32
    %c0_i32_0 = arith.constant 0 : i32
    %c0_i32_1 = arith.constant 0 : i32
    return %c0_i32, %c0_i32_0 : i32, i32
  }
  func.func @transform_5(%arg0: i32, %arg1: i32) -> (i32, i32) {
    %c0_i32 = arith.constant 0 : i32
    %c0_i32_0 = arith.constant 0 : i32
    return %arg0, %c0_i32 : i32, i32
  }
  func.func @transform_6(%arg0: i32, %arg1: i32) -> (i32, i32) {
    %c0_i32 = arith.constant 0 : i32
    %c0_i32_0 = arith.constant 0 : i32
    return %arg0, %c0_i32 : i32, i32
  }
}

module attributes {stable_mosaic.version = 11 : i64} {
  func.func @_agg_kernel(%arg0: i32, %arg1: i32, %arg2: memref<128x128xbf16, #tpu.memory_space<vmem>>, %arg3: memref<128x128xbf16, #tpu.memory_space<vmem>>, %arg4: memref<1x128xf32, #tpu.memory_space<vmem>>, %arg5: memref<128x128xf32, #tpu.memory_space<vmem>>, %arg6: memref<128x128xf32, #tpu.memory_space<vmem>>) attributes {dimension_semantics = [#tpu.dimension_semantics<parallel>, #tpu.dimension_semantics<arbitrary>], iteration_bounds = array<i64: 1, 1>, scalar_prefetch = 0 : i64, scratch_operands = 1 : i64, tpu.core_type = #tpu.core_type<tc>, window_params = [{transform_indices = @transform_0, window_bounds = array<i64: 128, 128>}, {transform_indices = @transform_1, window_bounds = array<i64: 128, 128>}, {pipeline_mode = #tpu.pipeline_mode<synchronous>, transform_indices = @transform_2, window_bounds = array<i64: 1, 128>}, {transform_indices = @transform_3, window_bounds = array<i64: 128, 128>}]} {
    %c0_i32 = arith.constant 0 : i32
    %0 = arith.cmpi eq, %arg1, %c0_i32 : i32
    %1 = arith.extui %0 : i1 to i32
    %c0_i32_0 = arith.constant 0 : i32
    %2 = arith.cmpi ne, %1, %c0_i32_0 : i32
    scf.if %2 {
      %cst_10 = arith.constant 0.000000e+00 : f32
      %12 = vector.broadcast %cst_10 : f32 to vector<128x128xf32>
      %c0_11 = arith.constant 0 : index
      %c0_12 = arith.constant 0 : index
      %13 = vector.load %arg6[%c0_11, %c0_12] : memref<128x128xf32, #tpu.memory_space<vmem>>, vector<128x128xf32>
      tpu.vector_store %arg6[%c0_11, %c0_12], %12 {strides = array<i32>} : memref<128x128xf32, #tpu.memory_space<vmem>>, vector<128x128xf32>,
    } else {
    }
    %c0 = arith.constant 0 : index
    %c0_1 = arith.constant 0 : index
    %3 = vector.load %arg6[%c0, %c0_1] : memref<128x128xf32, #tpu.memory_space<vmem>>, vector<128x128xf32>
    %c0_2 = arith.constant 0 : index
    %c0_3 = arith.constant 0 : index
    %4 = vector.load %arg2[%c0_2, %c0_3] : memref<128x128xbf16, #tpu.memory_space<vmem>>, vector<128x128xbf16>
    %c0_4 = arith.constant 0 : index
    %c0_5 = arith.constant 0 : index
    %5 = vector.load %arg3[%c0_4, %c0_5] : memref<128x128xbf16, #tpu.memory_space<vmem>>, vector<128x128xbf16>
    %cst = arith.constant dense<0.000000e+00> : vector<128x128xf32>
    %6 = tpu.matmul %4, %5, %cst {dimension_numbers = #tpu.dot_dimension_numbers<[1], [0], [0], [1], [0, 0, 1, 1], [], []>} : vector<128x128xbf16>, vector<128x128xbf16>, vector<128x128xf32> -> vector<128x128xf32>
    %7 = arith.addf %3, %6 : vector<128x128xf32>
    %c0_6 = arith.constant 0 : index
    %c0_7 = arith.constant 0 : index
    %8 = vector.load %arg6[%c0_6, %c0_7] : memref<128x128xf32, #tpu.memory_space<vmem>>, vector<128x128xf32>
    tpu.vector_store %arg6[%c0_6, %c0_7], %7 {strides = array<i32>} : memref<128x128xf32, #tpu.memory_space<vmem>>, vector<128x128xf32>,
    %c0_i32_8 = arith.constant 0 : i32
    %9 = arith.cmpi eq, %arg1, %c0_i32_8 : i32
    %10 = arith.extui %9 : i1 to i32
    %c0_i32_9 = arith.constant 0 : i32
    %11 = arith.cmpi ne, %10, %c0_i32_9 : i32
    scf.if %11 {
      %c0_10 = arith.constant 0 : index
      %c0_11 = arith.constant 0 : index
      %12 = vector.load %arg6[%c0_10, %c0_11] : memref<128x128xf32, #tpu.memory_space<vmem>>, vector<128x128xf32>
      %c0_12 = arith.constant 0 : index
      %c0_13 = arith.constant 0 : index
      %13 = vector.load %arg4[%c0_12, %c0_13] : memref<1x128xf32, #tpu.memory_space<vmem>>, vector<1x128xf32>
      %14 = vector.broadcast %13 : vector<1x128xf32> to vector<128x128xf32>
      %15 = arith.addf %12, %14 : vector<128x128xf32>
      %cst_14 = arith.constant 0.000000e+00 : f32
      %16 = vector.broadcast %cst_14 : f32 to vector<128x128xf32>
      %17 = arith.maximumf %15, %16 : vector<128x128xf32>
      %c0_15 = arith.constant 0 : index
      %c0_16 = arith.constant 0 : index
      %18 = vector.load %arg5[%c0_15, %c0_16] : memref<128x128xf32, #tpu.memory_space<vmem>>, vector<128x128xf32>
      tpu.vector_store %arg5[%c0_15, %c0_16], %17 {strides = array<i32>} : memref<128x128xf32, #tpu.memory_space<vmem>>, vector<128x128xf32>,
    } else {
    }
    return
  }
  func.func @transform_0(%arg0: i32, %arg1: i32) -> (i32, i32) {
    %c0_i32 = arith.constant 0 : i32
    return %arg0, %arg1 : i32, i32
  }
  func.func @transform_1(%arg0: i32, %arg1: i32) -> (i32, i32) {
    %c0_i32 = arith.constant 0 : i32
    %c0_i32_0 = arith.constant 0 : i32
    return %arg1, %c0_i32 : i32, i32
  }
  func.func @transform_2(%arg0: i32, %arg1: i32) -> (i32, i32) {
    %c0_i32 = arith.constant 0 : i32
    %c0_i32_0 = arith.constant 0 : i32
    %c0_i32_1 = arith.constant 0 : i32
    return %c0_i32, %c0_i32_0 : i32, i32
  }
  func.func @transform_3(%arg0: i32, %arg1: i32) -> (i32, i32) {
    %c0_i32 = arith.constant 0 : i32
    %c0_i32_0 = arith.constant 0 : i32
    return %arg0, %c0_i32 : i32, i32
  }
}

</mosaic_0001>

<bundles_post_ra>
// kernel: gcn_forward.6
= control target key start
LH: loop header
LB: loop body
LE: loop exit
PB: predicated region body
PF: predicated region fallthrough
CT: control target
= control target key end

     0   :  { %s551_s1 = inlined_call_operand.vmem [shape: bf16[128,128], index: 1, kind: input, shape index: {}]   ;;  %s552_s0 = inlined_call_operand.vmem [shape: f32[128,128], index: 0, kind: input, shape index: {}]   ;;  %s553_s2 = inlined_call_operand.vmem [shape: bf16[128,128], index: 2, kind: output, shape index: {}]  }
   0x1   :  { %v432_v0 = vld [vmem:[%s551_s1] sm:$0xff]   ;;  %v433_v1 = vld [vmem:[%s551_s1 + $0x8] sm:$0xff]   ;;  %v434_v2 = vld [vmem:[%s551_s1 + $0x10] sm:$0xff]  }
   0x2   :  { %384 = vmatprep.subr.bf16.mxu0 %v432_v0  ;;  %416 = vmatprep.subr.bf16.mxu1 %v432_v0  ;;  %v435_v3 = vld [vmem:[%s551_s1 + $0x18] sm:$0xff]   ;;  %v12_v4 = vld [vmem:[%s552_s0] sm:$0xff]  ;;  %v13_v5 = vld [vmem:[%s552_s0 + $0x8] sm:$0xff] }
   0x3   :  { %385 = vmatpush3.bf16.msra.mxu0 %v432_v0  ;;  %424 = vmatpush3.bf16.msra.mxu1 %v432_v0  ;;  %v20_v6 = vld [vmem:[%s552_s0 + $0x40] sm:$0xff]  ;;  %v28_v7 = vpack.c.bf16 %v13_v5, %v12_v4  ;;  %v21_v8 = vld [vmem:[%s552_s0 + $0x48] sm:$0xff]  ;;  %v438_v12 = vld [vmem:[%s551_s1 + $0x30] sm:$0xff]  }
   0x4   :  { %386 = vmatprep.subr.bf16.mxu0 %v433_v1  ;;  %417 = vmatprep.subr.bf16.mxu1 %v433_v1  ;;  %v32_v9 = vpack.c.bf16 %v21_v8, %v20_v6  ;;  %v436_v10 = vld [vmem:[%s551_s1 + $0x20] sm:$0xff]   ;;  %v437_v11 = vld [vmem:[%s551_s1 + $0x28] sm:$0xff]   ;;  %v439_v13 = vld [vmem:[%s551_s1 + $0x38] sm:$0xff]  }
   0x5   :  { %400 = vmatprep.mubr.bf16.mxu0 %v28_v7  ;;  %v14_v14 = vld [vmem:[%s552_s0 + $0x10] sm:$0xff]  ;;  %v15_v15 = vld [vmem:[%s552_s0 + $0x18] sm:$0xff]  ;;  %v16_v18 = vld [vmem:[%s552_s0 + $0x20] sm:$0xff] }
   0x6   :  { %408 = vmatprep.mubr.bf16.mxu1 %v32_v9  ;;  %v22_v16 = vld [vmem:[%s552_s0 + $0x50] sm:$0xff]  ;;  %v23_v17 = vld [vmem:[%s552_s0 + $0x58] sm:$0xff]  ;;  %v17_v19 = vld [vmem:[%s552_s0 + $0x28] sm:$0xff]  ;;  %v29_v22 = vpack.c.bf16 %v15_v15, %v14_v14 }
   0x7   :  { %387 = vmatpush3.bf16.msra.mxu0 %v433_v1  ;;  %425 = vmatpush3.bf16.msra.mxu1 %v433_v1  ;;  %v24_v20 = vld [vmem:[%s552_s0 + $0x60] sm:$0xff]  ;;  %v25_v21 = vld [vmem:[%s552_s0 + $0x68] sm:$0xff]  ;;  %v33_v23 = vpack.c.bf16 %v23_v17, %v22_v16  ;;  %v30_v24 = vpack.c.bf16 %v17_v19, %v16_v18  ;;  %v18_v26 = vld [vmem:[%s552_s0 + $0x30] sm:$0xff] }
   0x8   :  { %388 = vmatprep.subr.bf16.mxu0 %v434_v2  ;;  %418 = vmatprep.subr.bf16.mxu1 %v434_v2  ;;  %v34_v25 = vpack.c.bf16 %v25_v21, %v24_v20  ;;  %v19_v27 = vld [vmem:[%s552_s0 + $0x38] sm:$0xff]  ;;  %v26_v28 = vld [vmem:[%s552_s0 + $0x70] sm:$0xff] }
   0x9   :  { %v27_v29 = vld [vmem:[%s552_s0 + $0x78] sm:$0xff]  ;;  %v31_v30 = vpack.c.bf16 %v19_v27, %v18_v26 }
   0xa   :  { %v35_v31 = vpack.c.bf16 %v27_v29, %v26_v28 }
   0xb   :  { %389 = vmatpush3.bf16.msra.mxu0 %v434_v2  ;;  %426 = vmatpush3.bf16.msra.mxu1 %v434_v2 }
   0xc   :  { %390 = vmatprep.subr.bf16.mxu0 %v435_v3  ;;  %419 = vmatprep.subr.bf16.mxu1 %v435_v3 }
   0xf   :  { %391 = vmatpush3.bf16.msra.mxu0 %v435_v3  ;;  %427 = vmatpush3.bf16.msra.mxu1 %v435_v3 }
  0x10   :  { %392 = vmatprep.subr.bf16.mxu0 %v436_v10  ;;  %420 = vmatprep.subr.bf16.mxu1 %v436_v10 }
  0x13   :  { %393 = vmatpush3.bf16.msra.mxu0 %v436_v10  ;;  %428 = vmatpush3.bf16.msra.mxu1 %v436_v10 }
  0x14   :  { %394 = vmatprep.subr.bf16.mxu0 %v437_v11  ;;  %421 = vmatprep.subr.bf16.mxu1 %v437_v11 }
  0x17   :  { %395 = vmatpush3.bf16.msra.mxu0 %v437_v11  ;;  %429 = vmatpush3.bf16.msra.mxu1 %v437_v11 }
  0x18   :  { %396 = vmatprep.subr.bf16.mxu0 %v438_v12  ;;  %422 = vmatprep.subr.bf16.mxu1 %v438_v12 }
  0x1b   :  { %397 = vmatpush3.bf16.msra.mxu0 %v438_v12  ;;  %430 = vmatpush3.bf16.msra.mxu1 %v438_v12 }
  0x1c   :  { %398 = vmatprep.subr.bf16.mxu0 %v439_v13  ;;  %423 = vmatprep.subr.bf16.mxu1 %v439_v13 }
  0x1f   :  { %399 = vmatpush3.bf16.msra.mxu0 %v439_v13  ;;  %431 = vmatpush3.bf16.msra.mxu1 %v439_v13 }
  0x22   :  { %401 = vmatmul.mubr.bf16.vlgmr.msra.gmra.mrb[0].mxu0 %v29_v22  ;;  %409 = vmatmul.mubr.bf16.vlgmr.msra.gmra.mrb[0].mxu1 %v33_v23 }
  0x23   :  { %404 = vmatprep.mubr.bf16.mxu0 %v30_v24  ;;  %412 = vmatprep.mubr.bf16.mxu1 %v34_v25 }
  0x2a   :  { %405 = vmatmul.mubr.bf16.gmra.mrb[4].mxu0 %v31_v30  ;;  %413 = vmatmul.mubr.bf16.gmra.mrb[4].mxu1 %v35_v31 }
  0xf5   :  { %v402_v32 = vpop.f32.mrb[0].mxu0  ;;  %v410_v33 = vpop.f32.mrb[0].mxu1 }
  0xf6   :  { %v134_v34 = vpop.f32.mrb[1].mxu0  ;;  %v166_v35 = vpop.f32.mrb[1].mxu1 }
  0xf7   :  { %v403_v36 = vpop.f32.mrb[2].mxu0  ;;  %v411_v37 = vpop.f32.mrb[2].mxu1 }
  0xf8   :  { %v329_v38 = vpack.c.bf16 %v403_v36, %v402_v32  ;;  %v349_v39 = vpack.c.bf16 %v411_v37, %v410_v33  ;;  %v137_v40 = vpop.f32.mrb[3].mxu0  ;;  %v169_v41 = vpop.f32.mrb[3].mxu1 }
  0xf9   :  { %v324_v42 = vpack.c.bf16 %v137_v40, %v134_v34  ;;  %v344_v43 = vpack.c.bf16 %v169_v41, %v166_v35 }
  0xfa   :  { %361 = vst [vmem:[%s553_s2 + $0x8] sm:$0xff] %v329_v38   ;;  %365 = vst [vmem:[%s553_s2 + $0x28] sm:$0xff] %v349_v39  }
  0xfb   :  { %325 = vst [vmem:[%s553_s2] sm:$0xff] %v324_v42   ;;  %364 = vst [vmem:[%s553_s2 + $0x20] sm:$0xff] %v344_v43  }
  0xfd   :  { %v406_v44 = vpop.f32.mrb[4].mxu0  ;;  %v414_v45 = vpop.f32.mrb[4].mxu1 }
  0xfe   :  { %v150_v46 = vpop.f32.mrb[5].mxu0  ;;  %v182_v47 = vpop.f32.mrb[5].mxu1 }
  0xff   :  { %v407_v48 = vpop.f32.mrb[6].mxu0  ;;  %v415_v49 = vpop.f32.mrb[6].mxu1 }
 0x100   :  { %v339_v50 = vpack.c.bf16 %v407_v48, %v406_v44  ;;  %v359_v51 = vpack.c.bf16 %v415_v49, %v414_v45  ;;  %v153_v52 = vpop.f32.mrb[7].mxu0  ;;  %v185_v53 = vpop.f32.mrb[7].mxu1 }
 0x101   :  { %v334_v54 = vpack.c.bf16 %v153_v52, %v150_v46  ;;  %v354_v55 = vpack.c.bf16 %v185_v53, %v182_v47 }
 0x102   :  { %363 = vst [vmem:[%s553_s2 + $0x18] sm:$0xff] %v339_v50   ;;  %367 = vst [vmem:[%s553_s2 + $0x38] sm:$0xff] %v359_v51  }
 0x103   :  { %362 = vst [vmem:[%s553_s2 + $0x10] sm:$0xff] %v334_v54   ;;  %366 = vst [vmem:[%s553_s2 + $0x30] sm:$0xff] %v354_v55  }

// kernel: gcn_forward.7
= control target key start
LH: loop header
LB: loop body
LE: loop exit
PB: predicated region body
PF: predicated region fallthrough
CT: control target
= control target key end

     0   :  { %s602_s1 = inlined_call_operand.vmem [shape: bf16[128,128], index: 1, kind: input, shape index: {}]   ;;  %s603_s0 = inlined_call_operand.vmem [shape: bf16[128,128], index: 0, kind: input, shape index: {}]   ;;  %s604_s2 = inlined_call_operand.vmem [shape: f32[1,128], index: 2, kind: input, shape index: {}]   ;;  %s605_s3 = inlined_call_operand.vmem [shape: f32[128,128], index: 3, kind: output, shape index: {}]  }
   0x1   :  { %v467_v0 = vld [vmem:[%s602_s1] sm:$0xff]   ;;  %v468_v1 = vld [vmem:[%s602_s1 + $0x8] sm:$0xff]   ;;  %v469_v2 = vld [vmem:[%s602_s1 + $0x10] sm:$0xff]  }
   0x2   :  { %419 = vmatprep.subr.bf16.mxu0 %v467_v0  ;;  %451 = vmatprep.subr.bf16.mxu1 %v467_v0  ;;  %v470_v3 = vld [vmem:[%s602_s1 + $0x18] sm:$0xff]   ;;  %v475_v4 = vld [vmem:[%s603_s0] sm:$0xff]   ;;  %v472_v7 = vld [vmem:[%s602_s1 + $0x28] sm:$0xff]  }
   0x3   :  { %420 = vmatpush3.bf16.msra.mxu0 %v467_v0  ;;  %459 = vmatpush3.bf16.msra.mxu1 %v467_v0  ;;  %v476_v5 = vld [vmem:[%s603_s0 + $0x20] sm:$0xff]   ;;  %v473_v8 = vld [vmem:[%s602_s1 + $0x30] sm:$0xff]   ;;  %v474_v9 = vld [vmem:[%s602_s1 + $0x38] sm:$0xff]  }
   0x4   :  { %421 = vmatprep.subr.bf16.mxu0 %v468_v1  ;;  %452 = vmatprep.subr.bf16.mxu1 %v468_v1  ;;  %v471_v6 = vld [vmem:[%s602_s1 + $0x20] sm:$0xff]   ;;  %v477_v10 = vld [vmem:[%s603_s0 + $0x8] sm:$0xff]   ;;  %v479_v12 = vld [vmem:[%s603_s0 + $0x10] sm:$0xff]  }
   0x5   :  { %435 = vmatprep.mubr.bf16.mxu0 %v475_v4  ;;  %443 = vmatprep.mubr.bf16.mxu1 %v476_v5  ;;  %v478_v11 = vld [vmem:[%s603_s0 + $0x28] sm:$0xff]   ;;  %v480_v13 = vld [vmem:[%s603_s0 + $0x30] sm:$0xff]   ;;  %v481_v14 = vld [vmem:[%s603_s0 + $0x18] sm:$0xff]  }
   0x6   :  { %v482_v15 = vld [vmem:[%s603_s0 + $0x38] sm:$0xff]   ;;  %v402_v16 = vld [vmem:[%s604_s2] ss:$0 sm:$0xff] }
   0x7   :  { %422 = vmatpush3.bf16.msra.mxu0 %v468_v1  ;;  %460 = vmatpush3.bf16.msra.mxu1 %v468_v1 }
   0x8   :  { %423 = vmatprep.subr.bf16.mxu0 %v469_v2  ;;  %453 = vmatprep.subr.bf16.mxu1 %v469_v2 }
   0xb   :  { %424 = vmatpush3.bf16.msra.mxu0 %v469_v2  ;;  %461 = vmatpush3.bf16.msra.mxu1 %v469_v2 }
   0xc   :  { %425 = vmatprep.subr.bf16.mxu0 %v470_v3  ;;  %454 = vmatprep.subr.bf16.mxu1 %v470_v3 }
   0xf   :  { %426 = vmatpush3.bf16.msra.mxu0 %v470_v3  ;;  %462 = vmatpush3.bf16.msra.mxu1 %v470_v3 }
  0x10   :  { %427 = vmatprep.subr.bf16.mxu0 %v471_v6  ;;  %455 = vmatprep.subr.bf16.mxu1 %v471_v6 }
  0x13   :  { %428 = vmatpush3.bf16.msra.mxu0 %v471_v6  ;;  %463 = vmatpush3.bf16.msra.mxu1 %v471_v6 }
  0x14   :  { %429 = vmatprep.subr.bf16.mxu0 %v472_v7  ;;  %456 = vmatprep.subr.bf16.mxu1 %v472_v7 }
  0x17   :  { %430 = vmatpush3.bf16.msra.mxu0 %v472_v7  ;;  %464 = vmatpush3.bf16.msra.mxu1 %v472_v7 }
  0x18   :  { %431 = vmatprep.subr.bf16.mxu0 %v473_v8  ;;  %457 = vmatprep.subr.bf16.mxu1 %v473_v8 }
  0x1b   :  { %432 = vmatpush3.bf16.msra.mxu0 %v473_v8  ;;  %465 = vmatpush3.bf16.msra.mxu1 %v473_v8 }
  0x1c   :  { %433 = vmatprep.subr.bf16.mxu0 %v474_v9  ;;  %458 = vmatprep.subr.bf16.mxu1 %v474_v9 }
  0x1f   :  { %434 = vmatpush3.bf16.msra.mxu0 %v474_v9  ;;  %466 = vmatpush3.bf16.msra.mxu1 %v474_v9 }
  0x22   :  { %436 = vmatmul.mubr.bf16.vlgmr.msra.gmra.mrb[0].mxu0 %v477_v10  ;;  %444 = vmatmul.mubr.bf16.vlgmr.msra.gmra.mrb[0].mxu1 %v478_v11 }
  0x23   :  { %439 = vmatprep.mubr.bf16.mxu0 %v479_v12  ;;  %447 = vmatprep.mubr.bf16.mxu1 %v480_v13 }
  0x2a   :  { %440 = vmatmul.mubr.bf16.gmra.mrb[4].mxu0 %v481_v14  ;;  %448 = vmatmul.mubr.bf16.gmra.mrb[4].mxu1 %v482_v15 }
  0xf5   :  { %v437_v17 = vpop.f32.mrb[0].mxu0  ;;  %v445_v18 = vpop.f32.mrb[0].mxu1 }
  0xf6   :  { %v336_v19 = vadd.f32 %v437_v17, %v402_v16  ;;  %v344_v20 = vadd.f32 %v445_v18, %v402_v16  ;;  %v213_v21 = vpop.f32.mrb[1].mxu0  ;;  %v245_v22 = vpop.f32.mrb[1].mxu1 }
  0xf7   :  { %v334_v23 = vadd.f32 %v402_v16, %v213_v21  ;;  %v342_v24 = vadd.f32 %v402_v16, %v245_v22  ;;  %v438_v25 = vpop.f32.mrb[2].mxu0  ;;  %v446_v26 = vpop.f32.mrb[2].mxu1 }
  0xf8   :  { %v352_v27 = vmax.f32 %v336_v19, 0.0  ;;  %v360_v28 = vmax.f32 %v344_v20, 0.0  ;;  %v337_v29 = vadd.f32 %v438_v25, %v402_v16  ;;  %v345_v30 = vadd.f32 %v446_v26, %v402_v16  ;;  %v216_v31 = vpop.f32.mrb[3].mxu0  ;;  %v248_v32 = vpop.f32.mrb[3].mxu1 }
  0xf9   :  { %v350_v33 = vmax.f32 %v334_v23, 0.0  ;;  %v358_v34 = vmax.f32 %v342_v24, 0.0  ;;  %v335_v35 = vadd.f32 %v402_v16, %v216_v31  ;;  %v343_v36 = vadd.f32 %v402_v16, %v248_v32 }
  0xfa   :  { %368 = vst [vmem:[%s605_s3 + $0x10] sm:$0xff] %v352_v27  ;;  %376 = vst [vmem:[%s605_s3 + $0x50] sm:$0xff] %v360_v28  ;;  %v353_v37 = vmax.f32 %v337_v29, 0.0  ;;  %v361_v38 = vmax.f32 %v345_v30, 0.0 }
  0xfb   :  { %366 = vst [vmem:[%s605_s3] sm:$0xff] %v350_v33  ;;  %374 = vst [vmem:[%s605_s3 + $0x40] sm:$0xff] %v358_v34  ;;  %v351_v39 = vmax.f32 %v335_v35, 0.0  ;;  %v359_v40 = vmax.f32 %v343_v36, 0.0 }
  0xfc   :  { %369 = vst [vmem:[%s605_s3 + $0x18] sm:$0xff] %v353_v37  ;;  %377 = vst [vmem:[%s605_s3 + $0x58] sm:$0xff] %v361_v38 }
  0xfd   :  { %367 = vst [vmem:[%s605_s3 + $0x8] sm:$0xff] %v351_v39  ;;  %375 = vst [vmem:[%s605_s3 + $0x48] sm:$0xff] %v359_v40  ;;  %v441_v41 = vpop.f32.mrb[4].mxu0  ;;  %v449_v42 = vpop.f32.mrb[4].mxu1 }
  0xfe   :  { %v340_v43 = vadd.f32 %v441_v41, %v402_v16  ;;  %v348_v44 = vadd.f32 %v449_v42, %v402_v16  ;;  %v229_v45 = vpop.f32.mrb[5].mxu0  ;;  %v261_v46 = vpop.f32.mrb[5].mxu1 }
  0xff   :  { %v338_v47 = vadd.f32 %v402_v16, %v229_v45  ;;  %v346_v48 = vadd.f32 %v402_v16, %v261_v46  ;;  %v442_v49 = vpop.f32.mrb[6].mxu0  ;;  %v450_v50 = vpop.f32.mrb[6].mxu1 }
 0x100   :  { %v356_v51 = vmax.f32 %v340_v43, 0.0  ;;  %v364_v52 = vmax.f32 %v348_v44, 0.0  ;;  %v341_v53 = vadd.f32 %v442_v49, %v402_v16  ;;  %v349_v54 = vadd.f32 %v450_v50, %v402_v16  ;;  %v232_v55 = vpop.f32.mrb[7].mxu0  ;;  %v264_v56 = vpop.f32.mrb[7].mxu1 }
 0x101   :  { %v354_v57 = vmax.f32 %v338_v47, 0.0  ;;  %v362_v58 = vmax.f32 %v346_v48, 0.0  ;;  %v339_v59 = vadd.f32 %v402_v16, %v232_v55  ;;  %v347_v60 = vadd.f32 %v402_v16, %v264_v56 }
 0x102   :  { %372 = vst [vmem:[%s605_s3 + $0x30] sm:$0xff] %v356_v51  ;;  %380 = vst [vmem:[%s605_s3 + $0x70] sm:$0xff] %v364_v52  ;;  %v357_v61 = vmax.f32 %v341_v53, 0.0  ;;  %v365_v62 = vmax.f32 %v349_v54, 0.0 }
 0x103   :  { %370 = vst [vmem:[%s605_s3 + $0x20] sm:$0xff] %v354_v57  ;;  %378 = vst [vmem:[%s605_s3 + $0x60] sm:$0xff] %v362_v58  ;;  %v355_v63 = vmax.f32 %v339_v59, 0.0  ;;  %v363_v0 = vmax.f32 %v347_v60, 0.0 }
 0x104   :  { %373 = vst [vmem:[%s605_s3 + $0x38] sm:$0xff] %v357_v61  ;;  %381 = vst [vmem:[%s605_s3 + $0x78] sm:$0xff] %v365_v62 }
 0x105   :  { %371 = vst [vmem:[%s605_s3 + $0x28] sm:$0xff] %v355_v63  ;;  %379 = vst [vmem:[%s605_s3 + $0x68] sm:$0xff] %v363_v0 }

// kernel: gcn_forward.11
= control target key start
LH: loop header
LB: loop body
LE: loop exit
PB: predicated region body
PF: predicated region fallthrough
CT: control target
= control target key end

     0   :  { %s1339_s1 = inlined_call_operand.vmem [shape: bf16[128,128], index: 1, kind: input, shape index: {}]   ;;  %s1340_s0 = inlined_call_operand.vmem [shape: bf16[128,128], index: 0, kind: input, shape index: {}]   ;;  %s1341_s3 = inlined_call_operand.vmem [shape: f32[128,128], index: 3, kind: input, shape index: {}]   ;;  %s1342_s2 = inlined_call_operand.vmem [shape: f32[1,128], index: 2, kind: input, shape index: {}]   ;;  %s1343_s5 = inlined_call_operand.vmem [shape: f32[128,128], index: 5, kind: output, shape index: {0}]   ;;  %s1344_s4 = inlined_call_operand.vmem [shape: f32[1,128], index: 4, kind: input, shape index: {}]   ;;  %s1345_s6 = inlined_call_operand.vmem [shape: f32[128,128], index: 6, kind: output, shape index: {1}]  }
   0x1   :  { %v928_v0 = vld [vmem:[%s1339_s1] sm:$0xff]   ;;  %v929_v1 = vld [vmem:[%s1339_s1 + $0x8] sm:$0xff]   ;;  %v930_v2 = vld [vmem:[%s1339_s1 + $0x10] sm:$0xff]  }
   0x2   :  { %808 = vmatprep.subr.bf16.mxu0 %v928_v0  ;;  %v931_v3 = vld [vmem:[%s1339_s1 + $0x18] sm:$0xff]   ;;  %v936_v4 = vld [vmem:[%s1340_s0] sm:$0xff]   ;;  %v933_v6 = vld [vmem:[%s1339_s1 + $0x28] sm:$0xff]  }
   0x3   :  { %809 = vmatpush3.bf16.msra.mxu0 %v928_v0  ;;  %824 = vmatprep.mubr.bf16.mxu0 %v936_v4  ;;  %v932_v5 = vld [vmem:[%s1339_s1 + $0x20] sm:$0xff]   ;;  %v391_v8 = vld [vmem:[%s1341_s3 + $0x8] sm:$0xff]  ;;  %v392_v9 = vld [vmem:[%s1341_s3 + $0x10] sm:$0xff] }
   0x4   :  { %810 = vmatprep.subr.bf16.mxu0 %v929_v1  ;;  %v390_v7 = vld [vmem:[%s1341_s3] sm:$0xff]  ;;  %v393_v11 = vld [vmem:[%s1341_s3 + $0x18] sm:$0xff]  ;;  %v395_v14 = vld [vmem:[%s1341_s3 + $0x28] sm:$0xff] }
   0x5   :  { %v896_v10 = vpack.c.bf16 %v391_v8, %v390_v7  ;;  %v900_v12 = vpack.c.bf16 %v393_v11, %v392_v9  ;;  %v394_v13 = vld [vmem:[%s1341_s3 + $0x20] sm:$0xff]  ;;  %v934_v15 = vld [vmem:[%s1339_s1 + $0x30] sm:$0xff]   ;;  %v397_v18 = vld [vmem:[%s1341_s3 + $0x38] sm:$0xff] }
   0x6   :  { %v904_v16 = vpack.c.bf16 %v395_v14, %v394_v13  ;;  %v396_v17 = vld [vmem:[%s1341_s3 + $0x30] sm:$0xff]  ;;  %v935_v19 = vld [vmem:[%s1339_s1 + $0x38] sm:$0xff]   ;;  %v398_v21 = vld [vmem:[%s1341_s3 + $0x40] sm:$0xff] }
   0x7   :  { %811 = vmatpush3.bf16.msra.mxu0 %v929_v1  ;;  %897 = vmatprep.subr.bf16.mxu1 %v896_v10  ;;  %v908_v20 = vpack.c.bf16 %v397_v18, %v396_v17  ;;  %v399_v22 = vld [vmem:[%s1341_s3 + $0x48] sm:$0xff]  ;;  %v400_v25 = vld [vmem:[%s1341_s3 + $0x50] sm:$0xff]  ;;  %v401_v26 = vld [vmem:[%s1341_s3 + $0x58] sm:$0xff] }
   0x8   :  { %812 = vmatprep.subr.bf16.mxu0 %v930_v2  ;;  %899 = vmatpush3.bf16.msra.mxu1 %v896_v10  ;;  %v912_v23 = vpack.c.bf16 %v399_v22, %v398_v21  ;;  %v937_v24 = vld [vmem:[%s1340_s0 + $0x8] sm:$0xff]   ;;  %v938_v27 = vld [vmem:[%s1340_s0 + $0x10] sm:$0xff]   ;;  %v916_v28 = vpack.c.bf16 %v401_v26, %v400_v25  ;;  %v939_v29 = vld [vmem:[%s1340_s0 + $0x18] sm:$0xff]  }
   0x9   :  { %901 = vmatprep.subr.bf16.mxu1 %v900_v12  ;;  %v940_v30 = vld [vmem:[%s1340_s0 + $0x20] sm:$0xff]   ;;  %v941_v31 = vld [vmem:[%s1340_s0 + $0x28] sm:$0xff]   ;;  %v942_v32 = vld [vmem:[%s1340_s0 + $0x30] sm:$0xff]  }
   0xa   :  { %v943_v33 = vld [vmem:[%s1340_s0 + $0x38] sm:$0xff]   ;;  %v402_v34 = vld [vmem:[%s1341_s3 + $0x60] sm:$0xff]  ;;  %v403_v35 = vld [vmem:[%s1341_s3 + $0x68] sm:$0xff] }
   0xb   :  { %813 = vmatpush3.bf16.msra.mxu0 %v930_v2  ;;  %v920_v36 = vpack.c.bf16 %v403_v35, %v402_v34  ;;  %v404_v37 = vld [vmem:[%s1341_s3 + $0x70] sm:$0xff]  ;;  %v405_v38 = vld [vmem:[%s1341_s3 + $0x78] sm:$0xff]  ;;  %v1142_v40 = vld [vmem:[%s1342_s2] ss:$0 sm:$0xff] }
   0xc   :  { %814 = vmatprep.subr.bf16.mxu0 %v931_v3  ;;  %903 = vmatpush3.bf16.msra.mxu1 %v900_v12  ;;  %v924_v39 = vpack.c.bf16 %v405_v38, %v404_v37  ;;  %v759_v25 = vld [vmem:[%s1344_s4] ss:$0 sm:$0xff] }
   0xd   :  { %905 = vmatprep.subr.bf16.mxu1 %v904_v16 }
   0xf   :  { %815 = vmatpush3.bf16.msra.mxu0 %v931_v3 }
  0x10   :  { %816 = vmatprep.subr.bf16.mxu0 %v932_v5  ;;  %907 = vmatpush3.bf16.msra.mxu1 %v904_v16 }
  0x11   :  { %909 = vmatprep.subr.bf16.mxu1 %v908_v20 }
  0x13   :  { %817 = vmatpush3.bf16.msra.mxu0 %v932_v5 }
  0x14   :  { %818 = vmatprep.subr.bf16.mxu0 %v933_v6  ;;  %911 = vmatpush3.bf16.msra.mxu1 %v908_v20 }
  0x15   :  { %913 = vmatprep.subr.bf16.mxu1 %v912_v23 }
  0x17   :  { %819 = vmatpush3.bf16.msra.mxu0 %v933_v6 }
  0x18   :  { %820 = vmatprep.subr.bf16.mxu0 %v934_v15  ;;  %915 = vmatpush3.bf16.msra.mxu1 %v912_v23 }
  0x19   :  { %917 = vmatprep.subr.bf16.mxu1 %v916_v28 }
  0x1b   :  { %821 = vmatpush3.bf16.msra.mxu0 %v934_v15 }
  0x1c   :  { %822 = vmatprep.subr.bf16.mxu0 %v935_v19  ;;  %919 = vmatpush3.bf16.msra.mxu1 %v916_v28 }
  0x1d   :  { %921 = vmatprep.subr.bf16.mxu1 %v920_v36 }
  0x1f   :  { %823 = vmatpush3.bf16.msra.mxu0 %v935_v19 }
  0x20   :  { %923 = vmatpush3.bf16.msra.mxu1 %v920_v36 }
  0x21   :  { %925 = vmatprep.subr.bf16.mxu1 %v924_v39 }
  0x22   :  { %825 = vmatmul.mubr.bf16.vlgmr.msra.gmra.mrb[0].mxu0 %v937_v24 }
  0x23   :  { %828 = vmatprep.mubr.bf16.mxu0 %v938_v27 }
  0x24   :  { %927 = vmatpush3.bf16.msra.mxu1 %v924_v39 }
  0x2a   :  { %829 = vmatmul.mubr.bf16.gmra.mrb[4].mxu0 %v939_v29 }
  0x2b   :  { %832 = vmatprep.mubr.bf16.mxu0 %v940_v30 }
  0x32   :  { %833 = vmatmul.mubr.bf16.gmra.mrb[8].mxu0 %v941_v31 }
  0x33   :  { %836 = vmatprep.mubr.bf16.mxu0 %v942_v32 }
  0x3a   :  { %837 = vmatmul.mubr.bf16.gmra.mrb[12].mxu0 %v943_v33 }
  0xf5   :  { %v826_v41 = vpop.f32.mrb[0].mxu0 }
  0xf6   :  { %v344_v42 = vadd.f32 %v826_v41, %v1142_v40  ;;  %v221_v43 = vpop.f32.mrb[1].mxu0 }
  0xf7   :  { %v342_v44 = vadd.f32 %v1142_v40, %v221_v43  ;;  %v827_v45 = vpop.f32.mrb[2].mxu0 }
  0xf8   :  { %360 = vst [vmem:[%s1343_s5 + $0x10] sm:$0xff] %v344_v42  ;;  %v345_v46 = vadd.f32 %v827_v45, %v1142_v40  ;;  %v224_v47 = vpop.f32.mrb[3].mxu0  ;;  %v376_v51 = vmax.f32 %v344_v42, 0.0 }
  0xf9   :  { %358 = vst [vmem:[%s1343_s5] sm:$0xff] %v342_v44  ;;  %v343_v48 = vadd.f32 %v1142_v40, %v224_v47  ;;  %v374_v49 = vmax.f32 %v342_v44, 0.0 }
  0xfa   :  { %361 = vst [vmem:[%s1343_s5 + $0x18] sm:$0xff] %v345_v46  ;;  %v377_v55 = vmax.f32 %v345_v46, 0.0 }
  0xfb   :  { %359 = vst [vmem:[%s1343_s5 + $0x8] sm:$0xff] %v343_v48  ;;  %v375_v50 = vmax.f32 %v343_v48, 0.0  ;;  %872 = vmatprep.mubr.f32.mxu1 %v374_v49 }
  0xfd   :  { %v830_v52 = vpop.f32.mrb[4].mxu0  ;;  %873 = vmatmul.mubr.f32.vlgmr.msra.gmra.mrb[0].mxu1 %v375_v50 }
  0xfe   :  { %v348_v53 = vadd.f32 %v830_v52, %v1142_v40  ;;  %v237_v54 = vpop.f32.mrb[5].mxu0  ;;  %875 = vmatprep.mubr.f32.mxu1 %v376_v51 }
  0xff   :  { %v346_v56 = vadd.f32 %v1142_v40, %v237_v54  ;;  %v831_v57 = vpop.f32.mrb[6].mxu0 }
 0x100   :  { %364 = vst [vmem:[%s1343_s5 + $0x30] sm:$0xff] %v348_v53  ;;  %v349_v58 = vadd.f32 %v831_v57, %v1142_v40  ;;  %v240_v59 = vpop.f32.mrb[7].mxu0  ;;  %v380_v62 = vmax.f32 %v348_v53, 0.0 }
 0x101   :  { %362 = vst [vmem:[%s1343_s5 + $0x20] sm:$0xff] %v346_v56  ;;  %v378_v60 = vmax.f32 %v346_v56, 0.0  ;;  %v347_v61 = vadd.f32 %v1142_v40, %v240_v59  ;;  %876 = vmatmul.mubr.f32.gmra.mrb[2].mxu1 %v377_v55 }
 0x102   :  { %365 = vst [vmem:[%s1343_s5 + $0x38] sm:$0xff] %v349_v58  ;;  %v381_v3 = vmax.f32 %v349_v58, 0.0 }
 0x103   :  { %363 = vst [vmem:[%s1343_s5 + $0x28] sm:$0xff] %v347_v61  ;;  %v379_v63 = vmax.f32 %v347_v61, 0.0  ;;  %878 = vmatprep.mubr.f32.mxu1 %v378_v60 }
 0x105   :  { %v834_v0 = vpop.f32.mrb[8].mxu0  ;;  %879 = vmatmul.mubr.f32.gmra.mrb[4].mxu1 %v379_v63 }
 0x106   :  { %v352_v1 = vadd.f32 %v834_v0, %v1142_v40  ;;  %v253_v2 = vpop.f32.mrb[9].mxu0  ;;  %881 = vmatprep.mubr.f32.mxu1 %v380_v62 }
 0x107   :  { %v350_v4 = vadd.f32 %v1142_v40, %v253_v2  ;;  %v835_v5 = vpop.f32.mrb[10].mxu0 }
 0x108   :  { %368 = vst [vmem:[%s1343_s5 + $0x50] sm:$0xff] %v352_v1  ;;  %v353_v6 = vadd.f32 %v835_v5, %v1142_v40  ;;  %v256_v7 = vpop.f32.mrb[11].mxu0  ;;  %v384_v10 = vmax.f32 %v352_v1, 0.0 }
 0x109   :  { %366 = vst [vmem:[%s1343_s5 + $0x40] sm:$0xff] %v350_v4  ;;  %v382_v8 = vmax.f32 %v350_v4, 0.0  ;;  %v351_v9 = vadd.f32 %v1142_v40, %v256_v7  ;;  %882 = vmatmul.mubr.f32.gmra.mrb[6].mxu1 %v381_v3 }
 0x10a   :  { %369 = vst [vmem:[%s1343_s5 + $0x58] sm:$0xff] %v353_v6  ;;  %v385_v15 = vmax.f32 %v353_v6, 0.0 }
 0x10b   :  { %367 = vst [vmem:[%s1343_s5 + $0x48] sm:$0xff] %v351_v9  ;;  %v383_v11 = vmax.f32 %v351_v9, 0.0  ;;  %884 = vmatprep.mubr.f32.mxu1 %v382_v8 }
 0x10d   :  { %v838_v12 = vpop.f32.mrb[12].mxu0  ;;  %885 = vmatmul.mubr.f32.gmra.mrb[8].mxu1 %v383_v11 }
 0x10e   :  { %v356_v13 = vadd.f32 %v838_v12, %v1142_v40  ;;  %v269_v14 = vpop.f32.mrb[13].mxu0  ;;  %887 = vmatprep.mubr.f32.mxu1 %v384_v10 }
 0x10f   :  { %v354_v16 = vadd.f32 %v1142_v40, %v269_v14  ;;  %v839_v17 = vpop.f32.mrb[14].mxu0 }
 0x110   :  { %372 = vst [vmem:[%s1343_s5 + $0x70] sm:$0xff] %v356_v13  ;;  %v357_v18 = vadd.f32 %v839_v17, %v1142_v40  ;;  %v272_v19 = vpop.f32.mrb[15].mxu0  ;;  %v388_v22 = vmax.f32 %v356_v13, 0.0 }
 0x111   :  { %370 = vst [vmem:[%s1343_s5 + $0x60] sm:$0xff] %v354_v16  ;;  %v386_v20 = vmax.f32 %v354_v16, 0.0  ;;  %v355_v21 = vadd.f32 %v1142_v40, %v272_v19  ;;  %888 = vmatmul.mubr.f32.gmra.mrb[10].mxu1 %v385_v15 }
 0x112   :  { %373 = vst [vmem:[%s1343_s5 + $0x78] sm:$0xff] %v357_v18  ;;  %v389_v24 = vmax.f32 %v357_v18, 0.0 }
 0x113   :  { %371 = vst [vmem:[%s1343_s5 + $0x68] sm:$0xff] %v355_v21  ;;  %v387_v23 = vmax.f32 %v355_v21, 0.0  ;;  %890 = vmatprep.mubr.f32.mxu1 %v386_v20 }
 0x115   :  { %891 = vmatmul.mubr.f32.gmra.mrb[12].mxu1 %v387_v23 }
 0x116   :  { %893 = vmatprep.mubr.f32.mxu1 %v388_v22 }
 0x119   :  { %894 = vmatmul.mubr.f32.gmra.mrb[14].mxu1 %v389_v24 }
 0x1d0   :  { %v874_v26 = vpop.f32.mrb[0].mxu1 }
 0x1d1   :  { %v485_v27 = vadd.f32 %v874_v26, %v759_v25  ;;  %v479_v28 = vpop.f32.mrb[1].mxu1 }
 0x1d2   :  { %v480_v30 = vadd.f32 %v759_v25, %v479_v28 }
 0x1d3   :  { %560 = vmax.xlane.f32.xlu0 %v485_v27 }
 0x1d4   :  { %v877_v29 = vpop.f32.mrb[2].mxu1 }
 0x1d5   :  { %v495_v31 = vadd.f32 %v877_v29, %v759_v25  ;;  %v489_v32 = vpop.f32.mrb[3].mxu1 }
 0x1d6   :  { %v490_v34 = vadd.f32 %v759_v25, %v489_v32 }
 0x1d7   :  { %564 = vmax.xlane.f32.xlu1 %v495_v31  ;;  %558 = vmax.xlane.f32.xlu0 %v480_v30 }
 0x1d8   :  { %v880_v33 = vpop.f32.mrb[4].mxu1 }
 0x1d9   :  { %v499_v35 = vpop.f32.mrb[5].mxu1  ;;  %v505_v38 = vadd.f32 %v880_v33, %v759_v25 }
 0x1da   :  { %v500_v36 = vadd.f32 %v759_v25, %v499_v35 }
 0x1db   :  { %562 = vmax.xlane.f32.xlu1 %v490_v34 }
 0x1dc   :  { %v883_v37 = vpop.f32.mrb[6].mxu1  ;;  %566 = vmax.xlane.f32.xlu0 %v500_v36 }
 0x1dd   :  { %v509_v39 = vpop.f32.mrb[7].mxu1  ;;  %v515_v42 = vadd.f32 %v883_v37, %v759_v25 }
 0x1de   :  { %v510_v40 = vadd.f32 %v759_v25, %v509_v39 }
 0x1df   :  { %568 = vmax.xlane.f32.xlu1 %v505_v38 }
 0x1e0   :  { %570 = vmax.xlane.f32.xlu0 %v510_v40  ;;  %v886_v41 = vpop.f32.mrb[8].mxu1 }
 0x1e1   :  { %v519_v43 = vpop.f32.mrb[9].mxu1  ;;  %v525_v46 = vadd.f32 %v886_v41, %v759_v25 }
 0x1e2   :  { %v520_v44 = vadd.f32 %v759_v25, %v519_v43 }
 0x1e3   :  { %572 = vmax.xlane.f32.xlu1 %v515_v42 }
 0x1e4   :  { %v889_v45 = vpop.f32.mrb[10].mxu1  ;;  %574 = vmax.xlane.f32.xlu0 %v520_v44 }
 0x1e5   :  { %v529_v47 = vpop.f32.mrb[11].mxu1  ;;  %v535_v50 = vadd.f32 %v889_v45, %v759_v25 }
 0x1e6   :  { %v530_v48 = vadd.f32 %v759_v25, %v529_v47 }
 0x1e7   :  { %576 = vmax.xlane.f32.xlu1 %v525_v46 }
 0x1e8   :  { %578 = vmax.xlane.f32.xlu0 %v530_v48  ;;  %v892_v49 = vpop.f32.mrb[12].mxu1 }
 0x1e9   :  { %v539_v51 = vpop.f32.mrb[13].mxu1  ;;  %v1214_v54 = vadd.f32 %v892_v49, %v759_v25 }
 0x1ea   :  { %v1211_v52 = vadd.f32 %v759_v25, %v539_v51 }
 0x1eb   :  { %580 = vmax.xlane.f32.xlu1 %v535_v50 }
 0x1ec   :  { %v895_v53 = vpop.f32.mrb[14].mxu1  ;;  %582 = vmax.xlane.f32.xlu0 %v1211_v52 }
 0x1ed   :  { %v549_v55 = vpop.f32.mrb[15].mxu1  ;;  %v1220_v57 = vadd.f32 %v895_v53, %v759_v25 }
 0x1ee   :  { %v1216_v56 = vadd.f32 %v759_v25, %v549_v55 }
 0x1ef   :  { %584 = vmax.xlane.f32.xlu1 %v1214_v54 }
 0x1f0   :  { %586 = vmax.xlane.f32.xlu0 %v1216_v56 }
 0x1f3   :  { %588 = vmax.xlane.f32.xlu1 %v1220_v57 }
 0x260   :  { %v561_v58 = vpop.xlane.xlu0 %560 }
 0x261   :  { %v1223_v59 = vsub.f32 %v485_v27, %v561_v58 }
 0x263   :  { %v608_v60 = vmul.f32 1.442695, %v1223_v59 }
 0x264   :  { %v565_v61 = vpop.xlane.xlu1 %564  ;;  %v559_v62 = vpop.xlane.xlu0 %558 }
 0x265   :  { %944 = vpow2.f32 %v608_v60  ;;  %v1226_v63 = vsub.f32 %v495_v31, %v565_v61  ;;  %v1228_v0 = vsub.f32 %v480_v30, %v559_v62 }
 0x267   :  { %v612_v1 = vmul.f32 1.442695, %v1226_v63  ;;  %v606_v2 = vmul.f32 1.442695, %v1228_v0 }
 0x268   :  { %v563_v3 = vpop.xlane.xlu1 %562 }
 0x269   :  { %946 = vpow2.f32 %v612_v1  ;;  %v1232_v4 = vsub.f32 %v490_v34, %v563_v3  ;;  %v567_v5 = vpop.xlane.xlu0 %566 }
 0x26a   :  { %948 = vpow2.f32 %v606_v2  ;;  %v1234_v6 = vsub.f32 %v500_v36, %v567_v5 }
 0x26b   :  { %v610_v7 = vmul.f32 1.442695, %v1232_v4 }
 0x26c   :  { %v569_v8 = vpop.xlane.xlu1 %568  ;;  %v614_v11 = vmul.f32 1.442695, %v1234_v6 }
 0x26d   :  { %950 = vpow2.f32 %v610_v7  ;;  %v1237_v9 = vsub.f32 %v505_v38, %v569_v8  ;;  %v571_v10 = vpop.xlane.xlu0 %570 }
 0x26e   :  { %v1240_v12 = vsub.f32 %v510_v40, %v571_v10 }
 0x26f   :  { %v945_v13 = vpop.eup %944  ;;  %v616_v14 = vmul.f32 1.442695, %v1237_v9 }
 0x270   :  { %v573_v15 = vpop.xlane.xlu1 %572  ;;  %640 = vadd.xlane.f32.xlu1 %v945_v13  ;;  %v618_v18 = vmul.f32 1.442695, %v1240_v12 }
 0x271   :  { %952 = vpow2.f32 %v616_v14  ;;  %v1243_v16 = vsub.f32 %v515_v42, %v573_v15  ;;  %v575_v17 = vpop.xlane.xlu0 %574 }
 0x272   :  { %954 = vpow2.f32 %v614_v11  ;;  %v1246_v19 = vsub.f32 %v520_v44, %v575_v17 }
 0x273   :  { %v947_v20 = vpop.eup %946  ;;  %v620_v21 = vmul.f32 1.442695, %v1243_v16 }
 0x274   :  { %v949_v22 = vpop.eup %948  ;;  %v577_v23 = vpop.xlane.xlu1 %576  ;;  %644 = vadd.xlane.f32.xlu1 %v947_v20  ;;  %v622_v26 = vmul.f32 1.442695, %v1246_v19 }
 0x275   :  { %956 = vpow2.f32 %v620_v21  ;;  %v1249_v24 = vsub.f32 %v525_v46, %v577_v23  ;;  %638 = vadd.xlane.f32.xlu0 %v949_v22  ;;  %v579_v25 = vpop.xlane.xlu0 %578 }
 0x276   :  { %958 = vpow2.f32 %v618_v18  ;;  %v1252_v27 = vsub.f32 %v530_v48, %v579_v25 }
 0x277   :  { %v951_v28 = vpop.eup %950  ;;  %v624_v29 = vmul.f32 1.442695, %v1249_v24 }
 0x278   :  { %v581_v30 = vpop.xlane.xlu1 %580  ;;  %v626_v33 = vmul.f32 1.442695, %v1252_v27 }
 0x279   :  { %960 = vpow2.f32 %v624_v29  ;;  %v1255_v31 = vsub.f32 %v535_v50, %v581_v30  ;;  %642 = vadd.xlane.f32.xlu0 %v951_v28  ;;  %v583_v32 = vpop.xlane.xlu0 %582 }
 0x27a   :  { %962 = vpow2.f32 %v622_v26  ;;  %v1259_v34 = vsub.f32 %v1211_v52, %v583_v32 }
 0x27b   :  { %v953_v35 = vpop.eup %952  ;;  %v628_v36 = vmul.f32 1.442695, %v1255_v31 }
 0x27c   :  { %v955_v37 = vpop.eup %954  ;;  %v585_v38 = vpop.xlane.xlu1 %584  ;;  %648 = vadd.xlane.f32.xlu1 %v953_v35  ;;  %v630_v41 = vmul.f32 1.442695, %v1259_v34 }
 0x27d   :  { %964 = vpow2.f32 %v628_v36  ;;  %v1263_v39 = vsub.f32 %v1214_v54, %v585_v38  ;;  %646 = vadd.xlane.f32.xlu0 %v955_v37  ;;  %v587_v40 = vpop.xlane.xlu0 %586 }
 0x27e   :  { %966 = vpow2.f32 %v626_v33  ;;  %v1267_v42 = vsub.f32 %v1216_v56, %v587_v40 }
 0x27f   :  { %v957_v43 = vpop.eup %956  ;;  %v632_v44 = vmul.f32 1.442695, %v1263_v39 }
 0x280   :  { %v959_v45 = vpop.eup %958  ;;  %652 = vadd.xlane.f32.xlu1 %v957_v43  ;;  %v589_v46 = vpop.xlane.xlu1 %588  ;;  %v634_v48 = vmul.f32 1.442695, %v1267_v42 }
 0x281   :  { %968 = vpow2.f32 %v632_v44  ;;  %v1271_v47 = vsub.f32 %v1220_v57, %v589_v46  ;;  %650 = vadd.xlane.f32.xlu0 %v959_v45 }
 0x282   :  { %970 = vpow2.f32 %v630_v41 }
 0x283   :  { %v961_v49 = vpop.eup %960  ;;  %v636_v50 = vmul.f32 1.442695, %v1271_v47 }
 0x284   :  { %v963_v51 = vpop.eup %962  ;;  %656 = vadd.xlane.f32.xlu1 %v961_v49 }
 0x285   :  { %972 = vpow2.f32 %v636_v50  ;;  %654 = vadd.xlane.f32.xlu0 %v963_v51 }
 0x286   :  { %974 = vpow2.f32 %v634_v48 }
 0x287   :  { %v965_v52 = vpop.eup %964 }
 0x288   :  { %v967_v53 = vpop.eup %966  ;;  %660 = vadd.xlane.f32.xlu1 %v965_v52 }
 0x289   :  { %658 = vadd.xlane.f32.xlu0 %v967_v53 }
 0x28b   :  { %v969_v54 = vpop.eup %968 }
 0x28c   :  { %v971_v55 = vpop.eup %970  ;;  %664 = vadd.xlane.f32.xlu1 %v969_v54 }
 0x28d   :  { %662 = vadd.xlane.f32.xlu0 %v971_v55 }
 0x28f   :  { %v973_v56 = vpop.eup %972 }
 0x290   :  { %v975_v57 = vpop.eup %974  ;;  %668 = vadd.xlane.f32.xlu1 %v973_v56 }
 0x291   :  { %666 = vadd.xlane.f32.xlu0 %v975_v57 }
 0x2fd   :  { %v641_v58 = vpop.xlane.xlu1 %640 }
 0x2fe   :  { %976 = vlog2.f32 %v641_v58 }
 0x301   :  { %v645_v60 = vpop.xlane.xlu1 %644 }
 0x302   :  { %978 = vlog2.f32 %v645_v60  ;;  %v639_v61 = vpop.xlane.xlu0 %638 }
 0x303   :  { %980 = vlog2.f32 %v639_v61 }
 0x306   :  { %v643_v62 = vpop.xlane.xlu0 %642 }
 0x307   :  { %982 = vlog2.f32 %v643_v62 }
 0x308   :  { %v977_v1 = vpop.eup %976 }
 0x309   :  { %v673_v2 = vmul.f32 0.6931472, %v977_v1  ;;  %v649_v3 = vpop.xlane.xlu1 %648 }
 0x30a   :  { %984 = vlog2.f32 %v649_v3  ;;  %v647_v5 = vpop.xlane.xlu0 %646 }
 0x30b   :  { %v703_v7 = vsub.f32 %v1223_v59, %v673_v2  ;;  %986 = vlog2.f32 %v647_v5 }
 0x30c   :  { %v979_v8 = vpop.eup %978 }
 0x30d   :  { %v981_v10 = vpop.eup %980  ;;  %719 = vst [vmem:[%s1345_s6 + $0x8] sm:$0xff] %v703_v7  ;;  %v677_v11 = vmul.f32 0.6931472, %v979_v8  ;;  %v653_v13 = vpop.xlane.xlu1 %652 }
 0x30e   :  { %v671_v14 = vmul.f32 0.6931472, %v981_v10  ;;  %988 = vlog2.f32 %v653_v13  ;;  %v651_v15 = vpop.xlane.xlu0 %650 }
 0x30f   :  { %v705_v17 = vsub.f32 %v1226_v63, %v677_v11  ;;  %990 = vlog2.f32 %v651_v15 }
 0x310   :  { %v702_v18 = vsub.f32 %v1228_v0, %v671_v14 }
 0x311   :  { %v983_v20 = vpop.eup %982  ;;  %721 = vst [vmem:[%s1345_s6 + $0x18] sm:$0xff] %v705_v17  ;;  %v657_v59 = vpop.xlane.xlu1 %656 }
 0x312   :  { %718 = vst [vmem:[%s1345_s6] sm:$0xff] %v702_v18  ;;  %v675_v21 = vmul.f32 0.6931472, %v983_v20  ;;  %992 = vlog2.f32 %v657_v59  ;;  %v655_v22 = vpop.xlane.xlu0 %654 }
 0x313   :  { %994 = vlog2.f32 %v655_v22 }
 0x314   :  { %v985_v23 = vpop.eup %984  ;;  %v704_v63 = vsub.f32 %v1232_v4, %v675_v21 }
 0x315   :  { %v987_v25 = vpop.eup %986  ;;  %v681_v26 = vmul.f32 0.6931472, %v985_v23  ;;  %v661_v0 = vpop.xlane.xlu1 %660 }
 0x316   :  { %720 = vst [vmem:[%s1345_s6 + $0x10] sm:$0xff] %v704_v63  ;;  %v679_v28 = vmul.f32 0.6931472, %v987_v25  ;;  %996 = vlog2.f32 %v661_v0  ;;  %v659_v29 = vpop.xlane.xlu0 %658 }
 0x317   :  { %v707_v30 = vsub.f32 %v1237_v9, %v681_v26  ;;  %998 = vlog2.f32 %v659_v29 }
 0x318   :  { %v989_v32 = vpop.eup %988  ;;  %v706_v33 = vsub.f32 %v1234_v6, %v679_v28 }
 0x319   :  { %v991_v35 = vpop.eup %990  ;;  %723 = vst [vmem:[%s1345_s6 + $0x28] sm:$0xff] %v707_v30  ;;  %v685_v4 = vmul.f32 0.6931472, %v989_v32  ;;  %v665_v36 = vpop.xlane.xlu1 %664 }
 0x31a   :  { %722 = vst [vmem:[%s1345_s6 + $0x20] sm:$0xff] %v706_v33  ;;  %v683_v37 = vmul.f32 0.6931472, %v991_v35  ;;  %1000 = vlog2.f32 %v665_v36  ;;  %v663_v38 = vpop.xlane.xlu0 %662 }
 0x31b   :  { %v709_v9 = vsub.f32 %v1243_v16, %v685_v4  ;;  %1002 = vlog2.f32 %v663_v38 }
 0x31c   :  { %v993_v40 = vpop.eup %992  ;;  %v708_v6 = vsub.f32 %v1240_v12, %v683_v37 }
 0x31d   :  { %v995_v41 = vpop.eup %994  ;;  %725 = vst [vmem:[%s1345_s6 + $0x38] sm:$0xff] %v709_v9  ;;  %v689_v43 = vmul.f32 0.6931472, %v993_v40  ;;  %v669_v44 = vpop.xlane.xlu1 %668 }
 0x31e   :  { %724 = vst [vmem:[%s1345_s6 + $0x30] sm:$0xff] %v708_v6  ;;  %v687_v45 = vmul.f32 0.6931472, %v995_v41  ;;  %1004 = vlog2.f32 %v669_v44  ;;  %v667_v46 = vpop.xlane.xlu0 %666 }
 0x31f   :  { %v711_v16 = vsub.f32 %v1249_v24, %v689_v43  ;;  %1006 = vlog2.f32 %v667_v46 }
 0x320   :  { %v997_v48 = vpop.eup %996  ;;  %v710_v12 = vsub.f32 %v1246_v19, %v687_v45 }
 0x321   :  { %v999_v49 = vpop.eup %998  ;;  %727 = vst [vmem:[%s1345_s6 + $0x48] sm:$0xff] %v711_v16  ;;  %v693_v50 = vmul.f32 0.6931472, %v997_v48 }
 0x322   :  { %726 = vst [vmem:[%s1345_s6 + $0x40] sm:$0xff] %v710_v12  ;;  %v691_v51 = vmul.f32 0.6931472, %v999_v49 }
 0x323   :  { %v713_v52 = vsub.f32 %v1255_v31, %v693_v50 }
 0x324   :  { %v1001_v53 = vpop.eup %1000  ;;  %v712_v24 = vsub.f32 %v1252_v27, %v691_v51 }
 0x325   :  { %v1003_v54 = vpop.eup %1002  ;;  %729 = vst [vmem:[%s1345_s6 + $0x58] sm:$0xff] %v713_v52  ;;  %v697_v19 = vmul.f32 0.6931472, %v1001_v53 }
 0x326   :  { %728 = vst [vmem:[%s1345_s6 + $0x50] sm:$0xff] %v712_v24  ;;  %v695_v55 = vmul.f32 0.6931472, %v1003_v54 }
 0x327   :  { %v715_v56 = vsub.f32 %v1263_v39, %v697_v19 }
 0x328   :  { %v1005_v57 = vpop.eup %1004  ;;  %v714_v58 = vsub.f32 %v1259_v34, %v695_v55 }
 0x329   :  { %v1007_v31 = vpop.eup %1006  ;;  %731 = vst [vmem:[%s1345_s6 + $0x68] sm:$0xff] %v715_v56  ;;  %v701_v27 = vmul.f32 0.6931472, %v1005_v57 }
 0x32a   :  { %730 = vst [vmem:[%s1345_s6 + $0x60] sm:$0xff] %v714_v58  ;;  %v699_v60 = vmul.f32 0.6931472, %v1007_v31 }
 0x32b   :  { %v717_v61 = vsub.f32 %v1271_v47, %v701_v27 }
 0x32c   :  { %v716_v62 = vsub.f32 %v1267_v42, %v699_v60 }
 0x32d   :  { %733 = vst [vmem:[%s1345_s6 + $0x78] sm:$0xff] %v717_v61 }
 0x32e   :  { %732 = vst [vmem:[%s1345_s6 + $0x70] sm:$0xff] %v716_v62 }

</bundles_post_ra>
